<compile_context>
chip_gen: v7x
topology: tpu7x:2x2x1
jax: 0.10.0
libtpu: 0.0.40
codegen_flags: <defaults>
</compile_context>

<pallas_src>
import jax
import jax.numpy as jnp
from jax.experimental import pallas as pl
from jax.experimental.pallas import tpu as pltpu

HIDDEN = 64
LANE = 128            # hidden dim is zero-padded to a lane multiple (resident, ~free)
DEFAULT_TILE_B = 2048  # batch tile for large replay batches


def _round_up(n, m):
    return ((n + m - 1) // m) * m


def dqn_kernel(x_ref, w1_ref, b1_ref, w2_ref, b2_ref, w3_ref, b3_ref, o_ref):
    # Layer 1: Linear + ReLU. MXU matmul (bf16 or f32 operands), f32 accumulation;
    # bias-add / ReLU stay f32 on the VPU.
    h1 = jnp.dot(x_ref[...], w1_ref[...], preferred_element_type=jnp.float32)
    h1 = jnp.maximum(h1 + b1_ref[...], 0.0)
    # Layer 2: Linear + ReLU.
    h2 = jnp.dot(h1.astype(w2_ref.dtype), w2_ref[...],
                 preferred_element_type=jnp.float32)
    h2 = jnp.maximum(h2 + b2_ref[...], 0.0)
    # Layer 3: Linear (Q-values). Output block is narrow (out_dim columns only):
    # masked vst for a few lanes is far cheaper than 32x the HBM writeback.
    out = jnp.dot(h2.astype(w3_ref.dtype), w3_ref[...],
                  preferred_element_type=jnp.float32)
    o_ref[...] = (out + b3_ref[...]).astype(o_ref.dtype)


def prepare_params(params, compute_dtype=jnp.bfloat16):
    """Zero-pad the hidden dim to a lane multiple (semantically inert: padded
    units compute ReLU(0)=0 and feed zero weight rows).  The input and output
    dims are NOT padded.  Matmul weights are cast to compute_dtype; biases stay
    f32 (they are added to the f32 accumulator)."""
    hid_p = _round_up(HIDDEN, LANE)

    def pad_cols(a, cols):
        return jnp.pad(a, ((0, 0), (0, cols - a.shape[1])))

    w1 = pad_cols(params["w1"], hid_p).astype(compute_dtype)            # (in_dim, hid_p)
    b1 = pad_cols(params["b1"], hid_p).astype(jnp.float32)              # (1, hid_p)
    w2 = jnp.pad(params["w2"], ((0, hid_p - HIDDEN), (0, hid_p - HIDDEN))
                 ).astype(compute_dtype)                                 # (hid_p, hid_p)
    b2 = pad_cols(params["b2"], hid_p).astype(jnp.float32)              # (1, hid_p)
    w3 = jnp.pad(params["w3"], ((0, hid_p - HIDDEN), (0, 0))
                 ).astype(compute_dtype)                                 # (hid_p, out_dim)
    b3 = params["b3"].astype(jnp.float32)                                # (1, out_dim)
    return w1, b1, w2, b2, w3, b3


def _pick_tile_b(B, tile_b, align):
    """Sublane-aligned batch tile.  For large batches, cap at ceil(B/2) so the
    grid always has >=2 steps and v7x's two TensorCores can shard the
    'parallel' batch axis.  Falls back to a single full-batch tile (block dim
    == array dim, always legal) for small B."""
    cap = -(-B // 2)                      # ceil(B/2)
    if cap >= 256:                        # only split when each half is real work
        tile_b = min(tile_b, cap)
    tile_b = _round_up(min(tile_b, B), align)
    if tile_b >= B:
        return B
    return tile_b


def dqn_forward(x, params, *, tile_b=DEFAULT_TILE_B, compute_dtype=jnp.bfloat16):
    """x: (B, input_dim) float32 (or already compute_dtype).
    params: dict of w1,b1,w2,b2,w3,b3 (unpadded, f32, weights stored (in, out))."""
    B, in_dim = x.shape
    out_dim = params["w3"].shape[1]
    w1, b1, w2, b2, w3, b3 = prepare_params(params, compute_dtype)
    hid_p = w2.shape[0]

    # Sublane packing: f32 -> 8 rows, bf16 -> 16 rows.
    align = 8 * (4 // jnp.dtype(compute_dtype).itemsize)
    tb = _pick_tile_b(B, tile_b, align)
    grid = (pl.cdiv(B, tb),)

    # Cast x to the matmul operand dtype (no-op if the caller already holds
    # bf16 observations); accumulation remains f32 inside the kernel.
    x_c = x if x.dtype == jnp.dtype(compute_dtype) else x.astype(compute_dtype)

    resident = lambda i: (0, 0)  # weights/biases stay in VMEM across all batch tiles

    out = pl.pallas_call(
        dqn_kernel,
        out_shape=jax.ShapeDtypeStruct((B, out_dim), jnp.float32),
        grid=grid,
        in_specs=[
            pl.BlockSpec((tb, in_dim), lambda i: (i, 0)),   # x: batch-tiled, unpadded
            pl.BlockSpec((in_dim, hid_p), resident),        # w1
            pl.BlockSpec((1, hid_p), resident),             # b1
            pl.BlockSpec((hid_p, hid_p), resident),         # w2
            pl.BlockSpec((1, hid_p), resident),             # b2
            pl.BlockSpec((hid_p, out_dim), resident),       # w3
            pl.BlockSpec((1, out_dim), resident),           # b3
        ],
        out_specs=pl.BlockSpec((tb, out_dim), lambda i: (i, 0)),  # narrow output
        compiler_params=pltpu.CompilerParams(
            dimension_semantics=("parallel",),              # v7x megacore sharding
        ),
    )(x_c, w1, b1, w2, b2, w3, b3)
    return out


def init_params(key, input_dim, output_dim):
    """Deterministic init mimicking PyTorch's default Linear init
    (uniform +/- 1/sqrt(fan_in)).  Weights stored (in, out); bias (1, out)."""
    keys = jax.random.split(key, 6)

    def lin(kw, kb, fan_in, fan_out):
        bound = 1.0 / jnp.sqrt(jnp.float32(fan_in))
        w = jax.random.uniform(kw, (fan_in, fan_out), jnp.float32, -bound, bound)
        b = jax.random.uniform(kb, (1, fan_out), jnp.float32, -bound, bound)
        return w, b

    w1, b1 = lin(keys[0], keys[1], input_dim, HIDDEN)
    w2, b2 = lin(keys[2], keys[3], HIDDEN, HIDDEN)
    w3, b3 = lin(keys[4], keys[5], HIDDEN, output_dim)
    return {"w1": w1, "b1": b1, "w2": w2, "b2": b2, "w3": w3, "b3": b3}


def dqn_ref(x, params):
    h = jnp.maximum(x @ params["w1"] + params["b1"], 0.0)
    h = jnp.maximum(h @ params["w2"] + params["b2"], 0.0)
    return h @ params["w3"] + params["b3"]


if __name__ == "__main__":
    key = jax.random.PRNGKey(0)
    k_params, k_x = jax.random.split(key)

    batch, input_dim, output_dim = 8, 16, 4
    params = init_params(k_params, input_dim, output_dim)
    x = jax.random.normal(k_x, (batch, input_dim), jnp.float32)
    ref = dqn_ref(x, params)

    # Default bf16-operand path (f32 accumulation): small Q-value drift vs f32.
    out_bf16 = jax.block_until_ready(dqn_forward(x, params))
    assert out_bf16.shape == (batch, output_dim)
    assert jnp.allclose(out_bf16, ref, atol=1e-1, rtol=5e-2)

    # f32 path: matches the PyTorch f32 module tightly.
    out_f32 = jax.block_until_ready(dqn_forward(x, params, compute_dtype=jnp.float32))
    assert out_f32.shape == (batch, output_dim)
    assert jnp.allclose(out_f32, ref, atol=1e-5, rtol=1e-5)

    # Larger batch that does not divide the tile: exercises >=2 grid steps
    # (megacore split) and the masked edge block (no batch padding in wrapper).
    big_B = 549
    xb = jax.random.normal(jax.random.PRNGKey(1), (big_B, input_dim), jnp.float32)
    ref_b = dqn_ref(xb, params)
    out_b_f32 = jax.block_until_ready(dqn_forward(xb, params, compute_dtype=jnp.float32))
    assert out_b_f32.shape == (big_B, output_dim)
    assert jnp.allclose(out_b_f32, ref_b, atol=1e-4, rtol=1e-4)
    out_b_bf16 = jax.block_until_ready(dqn_forward(xb, params))
    assert out_b_bf16.shape == (big_B, output_dim)
    assert jnp.allclose(out_b_bf16, ref_b, atol=1e-1, rtol=5e-2)

    print("KERNEL_OK")
</pallas_src>

<mosaic_0001>
module attributes {stable_mosaic.version = 11 : i64} {
  func.func @dqn_kernel(%arg0: i32, %arg1: memref<8x16xbf16, #tpu.memory_space<vmem>>, %arg2: memref<16x128xbf16, #tpu.memory_space<vmem>>, %arg3: memref<1x128xf32, #tpu.memory_space<vmem>>, %arg4: memref<128x128xbf16, #tpu.memory_space<vmem>>, %arg5: memref<1x128xf32, #tpu.memory_space<vmem>>, %arg6: memref<128x4xbf16, #tpu.memory_space<vmem>>, %arg7: memref<1x4xf32, #tpu.memory_space<vmem>>, %arg8: memref<8x4xf32, #tpu.memory_space<vmem>>) attributes {dimension_semantics = [#tpu.dimension_semantics<parallel>], iteration_bounds = array<i64: 1>, scalar_prefetch = 0 : i64, scratch_operands = 0 : i64, tpu.core_type = #tpu.core_type<tc>, window_params = [{transform_indices = @transform_0, window_bounds = array<i64: 8, 16>}, {pipeline_mode = #tpu.pipeline_mode<synchronous>, transform_indices = @transform_1, window_bounds = array<i64: 16, 128>}, {pipeline_mode = #tpu.pipeline_mode<synchronous>, transform_indices = @transform_2, window_bounds = array<i64: 1, 128>}, {pipeline_mode = #tpu.pipeline_mode<synchronous>, transform_indices = @transform_3, window_bounds = array<i64: 128, 128>}, {pipeline_mode = #tpu.pipeline_mode<synchronous>, transform_indices = @transform_4, window_bounds = array<i64: 1, 128>}, {pipeline_mode = #tpu.pipeline_mode<synchronous>, transform_indices = @transform_5, window_bounds = array<i64: 128, 4>}, {pipeline_mode = #tpu.pipeline_mode<synchronous>, transform_indices = @transform_6, window_bounds = array<i64: 1, 4>}, {transform_indices = @transform_7, window_bounds = array<i64: 8, 4>}]} {
    %c0 = arith.constant 0 : index
    %c0_0 = arith.constant 0 : index
    %0 = vector.load %arg1[%c0, %c0_0] : memref<8x16xbf16, #tpu.memory_space<vmem>>, vector<8x16xbf16>
    %c0_1 = arith.constant 0 : index
    %c0_2 = arith.constant 0 : index
    %1 = vector.load %arg2[%c0_1, %c0_2] : memref<16x128xbf16, #tpu.memory_space<vmem>>, vector<16x128xbf16>
    %cst = arith.constant dense<0.000000e+00> : vector<8x128xf32>
    %2 = tpu.matmul %0, %1, %cst {dimension_numbers = #tpu.dot_dimension_numbers<[1], [0], [0], [1], [0, 0, 1, 1], [], []>} : vector<8x16xbf16>, vector<16x128xbf16>, vector<8x128xf32> -> vector<8x128xf32>
    %c0_3 = arith.constant 0 : index
    %c0_4 = arith.constant 0 : index
    %3 = vector.load %arg3[%c0_3, %c0_4] : memref<1x128xf32, #tpu.memory_space<vmem>>, vector<1x128xf32>
    %4 = vector.broadcast %3 : vector<1x128xf32> to vector<8x128xf32>
    %5 = arith.addf %2, %4 : vector<8x128xf32>
    %cst_5 = arith.constant 0.000000e+00 : f32
    %6 = vector.broadcast %cst_5 : f32 to vector<8x128xf32>
    %7 = arith.maximumf %5, %6 : vector<8x128xf32>
    %8 = arith.truncf %7 : vector<8x128xf32> to vector<8x128xbf16>
    %c0_6 = arith.constant 0 : index
    %c0_7 = arith.constant 0 : index
    %9 = vector.load %arg4[%c0_6, %c0_7] : memref<128x128xbf16, #tpu.memory_space<vmem>>, vector<128x128xbf16>
    %cst_8 = arith.constant dense<0.000000e+00> : vector<8x128xf32>
    %10 = tpu.matmul %8, %9, %cst_8 {dimension_numbers = #tpu.dot_dimension_numbers<[1], [0], [0], [1], [0, 0, 1, 1], [], []>} : vector<8x128xbf16>, vector<128x128xbf16>, vector<8x128xf32> -> vector<8x128xf32>
    %c0_9 = arith.constant 0 : index
    %c0_10 = arith.constant 0 : index
    %11 = vector.load %arg5[%c0_9, %c0_10] : memref<1x128xf32, #tpu.memory_space<vmem>>, vector<1x128xf32>
    %12 = vector.broadcast %11 : vector<1x128xf32> to vector<8x128xf32>
    %13 = arith.addf %10, %12 : vector<8x128xf32>
    %cst_11 = arith.constant 0.000000e+00 : f32
    %14 = vector.broadcast %cst_11 : f32 to vector<8x128xf32>
    %15 = arith.maximumf %13, %14 : vector<8x128xf32>
    %16 = arith.truncf %15 : vector<8x128xf32> to vector<8x128xbf16>
    %c0_12 = arith.constant 0 : index
    %c0_13 = arith.constant 0 : index
    %17 = vector.load %arg6[%c0_12, %c0_13] : memref<128x4xbf16, #tpu.memory_space<vmem>>, vector<128x4xbf16>
    %cst_14 = arith.constant dense<0.000000e+00> : vector<8x4xf32>
    %18 = tpu.matmul %16, %17, %cst_14 {dimension_numbers = #tpu.dot_dimension_numbers<[1], [0], [0], [1], [0, 0, 1, 1], [], []>} : vector<8x128xbf16>, vector<128x4xbf16>, vector<8x4xf32> -> vector<8x4xf32>
    %c0_15 = arith.constant 0 : index
    %c0_16 = arith.constant 0 : index
    %19 = vector.load %arg7[%c0_15, %c0_16] : memref<1x4xf32, #tpu.memory_space<vmem>>, vector<1x4xf32>
    %20 = vector.broadcast %19 : vector<1x4xf32> to vector<8x4xf32>
    %21 = arith.addf %18, %20 : vector<8x4xf32>
    %c0_17 = arith.constant 0 : index
    %c0_18 = arith.constant 0 : index
    %22 = vector.load %arg8[%c0_17, %c0_18] : memref<8x4xf32, #tpu.memory_space<vmem>>, vector<8x4xf32>
    tpu.vector_store %arg8[%c0_17, %c0_18], %21 {strides = array<i32>} : memref<8x4xf32, #tpu.memory_space<vmem>>, vector<8x4xf32>,
    return
  }
  func.func @transform_0(%arg0: i32) -> (i32, i32) {
    %c0_i32 = arith.constant 0 : i32
    %c0_i32_0 = arith.constant 0 : i32
    return %arg0, %c0_i32 : i32, i32
  }
  func.func @transform_1(%arg0: i32) -> (i32, i32) {
    %c0_i32 = arith.constant 0 : i32
    %c0_i32_0 = arith.constant 0 : i32
    %c0_i32_1 = arith.constant 0 : i32
    return %c0_i32, %c0_i32_0 : i32, i32
  }
  func.func @transform_2(%arg0: i32) -> (i32, i32) {
    %c0_i32 = arith.constant 0 : i32
    %c0_i32_0 = arith.constant 0 : i32
    %c0_i32_1 = arith.constant 0 : i32
    return %c0_i32, %c0_i32_0 : i32, i32
  }
  func.func @transform_3(%arg0: i32) -> (i32, i32) {
    %c0_i32 = arith.constant 0 : i32
    %c0_i32_0 = arith.constant 0 : i32
    %c0_i32_1 = arith.constant 0 : i32
    return %c0_i32, %c0_i32_0 : i32, i32
  }
  func.func @transform_4(%arg0: i32) -> (i32, i32) {
    %c0_i32 = arith.constant 0 : i32
    %c0_i32_0 = arith.constant 0 : i32
    %c0_i32_1 = arith.constant 0 : i32
    return %c0_i32, %c0_i32_0 : i32, i32
  }
  func.func @transform_5(%arg0: i32) -> (i32, i32) {
    %c0_i32 = arith.constant 0 : i32
    %c0_i32_0 = arith.constant 0 : i32
    %c0_i32_1 = arith.constant 0 : i32
    return %c0_i32, %c0_i32_0 : i32, i32
  }
  func.func @transform_6(%arg0: i32) -> (i32, i32) {
    %c0_i32 = arith.constant 0 : i32
    %c0_i32_0 = arith.constant 0 : i32
    %c0_i32_1 = arith.constant 0 : i32
    return %c0_i32, %c0_i32_0 : i32, i32
  }
  func.func @transform_7(%arg0: i32) -> (i32, i32) {
    %c0_i32 = arith.constant 0 : i32
    %c0_i32_0 = arith.constant 0 : i32
    return %arg0, %c0_i32 : i32, i32
  }
}

</mosaic_0001>

<bundles_post_ra>
// kernel: tpu_custom_call.1
= control target key start
LH: loop header
LB: loop body
LE: loop exit
PB: predicated region body
PF: predicated region fallthrough
CT: control target
= control target key end

     0   :  { %v425_v0 = vmov 0.0   ;;  %vm426_vm0 = vmmov 0   ;;  %vm43_vm1 = vcmask 130048   ;;  %vm313_vm2 = vcmask 31744   ;;  %s553_s1 = inlined_call_operand.vmem [shape: bf16[16,128], index: 1, kind: input, shape index: {}]   ;;  %s554_s0 = inlined_call_operand.vmem [shape: bf16[8,16], index: 0, kind: input, shape index: {}]   ;;  %s555_s3 = inlined_call_operand.vmem [shape: bf16[128,128], index: 3, kind: input, shape index: {}]   ;;  %s556_s5 = inlined_call_operand.vmem [shape: bf16[128,4], index: 5, kind: input, shape index: {}]   ;;  %s557_s2 = inlined_call_operand.vmem [shape: f32[1,128], index: 2, kind: input, shape index: {}]   ;;  %s558_s4 = inlined_call_operand.vmem [shape: f32[1,128], index: 4, kind: input, shape index: {}]   ;;  %s559_s6 = inlined_call_operand.vmem [shape: f32[1,4], index: 6, kind: input, shape index: {}]   ;;  %s560_s7 = inlined_call_operand.vmem [shape: f32[8,4], index: 7, kind: output, shape index: {}]  }
   0x1   :  { %360 = vmatprep.subr.bf16.mxu0 %v425_v0  ;;  %v408_v1 = vld [vmem:[%s553_s1] sm:$0xff]   ;;  %362 = vmatprep.mubr.msk.bf16.mxu0 %vm426_vm0, %v425_v0  ;;  %v410_v4 = vld [vmem:[%s555_s3 + $0x8] sm:$0xff]   ;;  %v411_v5 = vld [vmem:[%s555_s3 + $0x10] sm:$0xff]  }
   0x2   :  { %v27_v2 = vld [vmem:[%s554_s0] sm:$0xf]  ;;  %366 = vmatprep.subr.bf16.mxu1 %v425_v0  ;;  %382 = vmatprep.mubr.msk.bf16.mxu1 %vm426_vm0, %v425_v0  ;;  %v412_v6 = vld [vmem:[%s555_s3 + $0x18] sm:$0xff]   ;;  %v414_v8 = vld [vmem:[%s555_s3 + $0x28] sm:$0xff]  }
   0x3   :  { %361 = vmatpush3.bf16.msra.mxu0 %v408_v1  ;;  %v409_v3 = vld [vmem:[%s555_s3] sm:$0xff]   ;;  %v415_v9 = vld [vmem:[%s555_s3 + $0x30] sm:$0xff]   ;;  %v416_v10 = vld [vmem:[%s555_s3 + $0x38] sm:$0xff]  }
   0x4   :  { %386 = vmatprep.subr.bf16.mxu0 %v425_v0  ;;  %367 = vmatpush3.bf16.msra.mxu1 %v409_v3  ;;  %v413_v7 = vld [vmem:[%s555_s3 + $0x20] sm:$0xff]   ;;  %v418_v12 = vld [vmem:[%s556_s5 + $0x8] sm:$0xff]   ;;  %v419_v13 = vld [vmem:[%s556_s5 + $0x10] sm:$0xff]  }
   0x5   :  { %368 = vmatprep.subr.bf16.mxu1 %v425_v0  ;;  %v417_v11 = vld [vmem:[%s556_s5] sm:$0xff]   ;;  %v420_v14 = vld [vmem:[%s556_s5 + $0x18] sm:$0xff]   ;;  %v422_v16 = vld [vmem:[%s556_s5 + $0x28] sm:$0xff]  }
   0x6   :  { %363 = vmatmul.mubr.msk.bf16.vlgmr.msra.gmra.mrb[0].mxu0 %vm43_vm1, %v27_v2  ;;  %v421_v15 = vld [vmem:[%s556_s5 + $0x20] sm:$0xff]   ;;  %v423_v25 = vld [vmem:[%s556_s5 + $0x30] sm:$0xff]   ;;  %v424_v26 = vld [vmem:[%s556_s5 + $0x38] sm:$0xff]  }
   0x7   :  { %402 = vmatprep.mubr.msk.bf16.mxu0 %vm426_vm0, %v425_v0  ;;  %387 = vmatpush3.bf16.msra.mxu0 %v417_v11  ;;  %v319_v17 = vld [vmem:[%s557_s2] ss:$0 sm:$0xff] }
   0x8   :  { %369 = vmatpush3.bf16.msra.mxu1 %v410_v4  ;;  %388 = vmatprep.subr.bf16.mxu0 %v425_v0  ;;  %v322_v27 = vld [vmem:[%s558_s4] ss:$0 sm:$0xff] }
   0x9   :  { %370 = vmatprep.subr.bf16.mxu1 %v425_v0  ;;  %v331_v35 = vld [vmem:[%s559_s6] ss:$0 sm:$0xff] }
   0xb   :  { %389 = vmatpush3.bf16.msra.mxu0 %v418_v12 }
   0xc   :  { %371 = vmatpush3.bf16.msra.mxu1 %v411_v5  ;;  %390 = vmatprep.subr.bf16.mxu0 %v425_v0 }
   0xd   :  { %372 = vmatprep.subr.bf16.mxu1 %v425_v0 }
   0xf   :  { %391 = vmatpush3.bf16.msra.mxu0 %v419_v13 }
  0x10   :  { %373 = vmatpush3.bf16.msra.mxu1 %v412_v6  ;;  %392 = vmatprep.subr.bf16.mxu0 %v425_v0 }
  0x11   :  { %374 = vmatprep.subr.bf16.mxu1 %v425_v0 }
  0x13   :  { %393 = vmatpush3.bf16.msra.mxu0 %v420_v14 }
  0x14   :  { %375 = vmatpush3.bf16.msra.mxu1 %v413_v7  ;;  %394 = vmatprep.subr.bf16.mxu0 %v425_v0 }
  0x15   :  { %376 = vmatprep.subr.bf16.mxu1 %v425_v0 }
  0x17   :  { %395 = vmatpush3.bf16.msra.mxu0 %v421_v15 }
  0x18   :  { %377 = vmatpush3.bf16.msra.mxu1 %v414_v8  ;;  %396 = vmatprep.subr.bf16.mxu0 %v425_v0 }
  0x19   :  { %378 = vmatprep.subr.bf16.mxu1 %v425_v0 }
  0x1b   :  { %397 = vmatpush3.bf16.msra.mxu0 %v422_v16 }
  0x1c   :  { %379 = vmatpush3.bf16.msra.mxu1 %v415_v9  ;;  %398 = vmatprep.subr.bf16.mxu0 %v425_v0 }
  0x1d   :  { %380 = vmatprep.subr.bf16.mxu1 %v425_v0 }
  0x1f   :  { %399 = vmatpush3.bf16.msra.mxu0 %v423_v25 }
  0x20   :  { %381 = vmatpush3.bf16.msra.mxu1 %v416_v10  ;;  %400 = vmatprep.subr.bf16.mxu0 %v425_v0 }
  0x23   :  { %401 = vmatpush3.bf16.msra.mxu0 %v424_v26 }
  0xd9   :  { %v81_v18 = vpop.f32.mrb[0].mxu0 }
  0xda   :  { %v82_v19 = vadd.f32 %v319_v17, %v81_v18  ;;  %v364_v20 = vpop.f32.mrb[1].mxu0 }
  0xdb   :  { %v84_v21 = vpop.f32.mrb[2].mxu0 }
  0xdc   :  { %v87_v22 = vmax.f32 %v82_v19, 0.0  ;;  %v365_v23 = vpop.f32.mrb[3].mxu0 }
  0xde   :  { %v88_v24 = vpack.c.bf16 %v87_v22, %v87_v22 }
  0xe0   :  { %383 = vmatmul.mubr.bf16.vlgmr.msra.gmra.mrb[0].mxu1 %v88_v24 }
 0x1b3   :  { %v194_v28 = vpop.f32.mrb[0].mxu1 }
 0x1b4   :  { %v195_v29 = vadd.f32 %v322_v27, %v194_v28  ;;  %v384_v30 = vpop.f32.mrb[1].mxu1 }
 0x1b5   :  { %v197_v31 = vpop.f32.mrb[2].mxu1 }
 0x1b6   :  { %v200_v32 = vmax.f32 %v195_v29, 0.0  ;;  %v385_v33 = vpop.f32.mrb[3].mxu1 }
 0x1b8   :  { %v201_v34 = vpack.c.bf16 %v200_v32, %v200_v32 }
 0x1ba   :  { %403 = vmatmul.mubr.bf16.vlgmr.msra.gmra.mrb[4].mxu0 %v201_v34 }
 0x28d   :  { %v307_v36 = vpop.f32.mrb[4].mxu0 }
 0x28e   :  { %v308_v37 = vadd.f32 %v331_v35, %v307_v36  ;;  %v404_v38 = vpop.f32.mrb[5].mxu0 }
 0x28f   :  { %v310_v39 = vpop.f32.mrb[6].mxu0 }
 0x290   :  { %314 = vst.msk [vmem:[%s560_s7] sm:$0xff] %vm313_vm2, %v308_v37  ;;  %v405_v40 = vpop.f32.mrb[7].mxu0 }

</bundles_post_ra>
